<compile_context>
chip_gen: v5e
topology: v5e:2x2
jax: 0.10.0
libtpu: 0.0.40
codegen_flags: <defaults>
</compile_context>

<pallas_src>
import functools

import jax
import jax.numpy as jnp
from jax.experimental import pallas as pl
from jax.experimental.pallas import tpu as pltpu


def _round_up(x, m):
    return (x + m - 1) // m * m


def _embed_ln_kernel(ids_ref, table_ref, bias_ref, gamma_ref, beta_ref,
                     out_ref, *, eps):
    ids = ids_ref[...]            # (tm, nid) int32
    table = table_ref[...]        # (K, H)  float32
    tm, nid = ids.shape
    K = table.shape[0]

    # Combined one-hot over the (possibly fused) vocab axis.  For nid > 1 the
    # index streams live in disjoint offset ranges, so summing the per-stream
    # one-hots is equivalent to gathering and summing the three embeddings.
    iota = jax.lax.broadcasted_iota(jnp.int32, (tm, K), 1)
    onehot = (ids[:, 0:1] == iota).astype(jnp.float32)
    for j in range(1, nid):       # static unrolled loop (nid is 1 or 3)
        onehot = onehot + (ids[:, j:j + 1] == iota).astype(jnp.float32)

    # Single [tm, K] @ [K, H] gather on the MXU (f32 one-hot x f32 table is
    # exact; cast both to bf16 in production if tolerance allows).
    emb = jnp.dot(onehot, table, preferred_element_type=jnp.float32)
    emb = emb + bias_ref[...]                       # folded pos/type bias

    # One-pass LayerNorm statistics over H (biased variance, like torch).
    h = emb.shape[-1]
    s1 = jnp.sum(emb, axis=-1, keepdims=True)
    s2 = jnp.sum(emb * emb, axis=-1, keepdims=True)
    mean = s1 * (1.0 / h)
    var = s2 * (1.0 / h) - mean * mean
    inv = jax.lax.rsqrt(var + eps)
    out = (emb - mean) * inv * gamma_ref[...] + beta_ref[...]

    # TODO(synk): dropout is identity (eval-mode); training-mode dropout would
    # use pltpu.prng_seed / pltpu.prng_random_bits.
    out_ref[...] = out.astype(out_ref.dtype)


def protein_bert_embeddings(input_ids, params, *, token_type_ids=None,
                            position_ids=None, layer_norm_eps=1e-12,
                            row_tile=128):
    """input_ids: [B, S] int32.  Returns [B, S, H] float32."""
    B, S = input_ids.shape
    word_tab = params["word_embeddings"].astype(jnp.float32)      # (V, H)
    pos_tab = params["position_embeddings"].astype(jnp.float32)   # (P, H)
    type_tab = params["token_type_embeddings"].astype(jnp.float32)  # (T, H)
    gamma = params["ln_weight"].reshape(1, -1).astype(jnp.float32)  # (1, H)
    beta = params["ln_bias"].reshape(1, -1).astype(jnp.float32)     # (1, H)
    V, H = word_tab.shape
    P = pos_tab.shape[0]
    M = B * S

    # Row tiling over the flattened (B*S) dimension.
    m8 = _round_up(M, 8)
    tm = min(row_tile, m8)                 # multiple of 8 by construction
    grid_m = pl.cdiv(m8, tm)
    m_pad = grid_m * tm

    if position_ids is None and token_type_ids is None:
        # Fast path: fold position + token-type embeddings into a static
        # per-row bias; the kernel only gathers word embeddings (K = V).
        ids = input_ids.reshape(M, 1).astype(jnp.int32)
        table = word_tab
        bias = pos_tab[:S] + type_tab[0][None, :]                  # (S, H)
        bias = jnp.broadcast_to(bias[None], (B, S, H)).reshape(M, H)
    else:
        if position_ids is None:
            position_ids = jnp.broadcast_to(
                jnp.arange(S, dtype=jnp.int32)[None, :], (B, S))
        if token_type_ids is None:
            token_type_ids = jnp.zeros_like(input_ids)
        # General path: fuse the three tables along the vocab axis and offset
        # the index streams so one combined one-hot matmul does all gathers.
        table = jnp.concatenate([word_tab, pos_tab, type_tab], axis=0)
        ids = jnp.stack(
            [input_ids.reshape(-1).astype(jnp.int32),
             position_ids.reshape(-1).astype(jnp.int32) + V,
             token_type_ids.reshape(-1).astype(jnp.int32) + V + P],
            axis=1)                                                # (M, 3)
        bias = jnp.zeros((M, H), jnp.float32)

    nid = ids.shape[1]
    K = table.shape[0]

    if m_pad != M:
        ids = jnp.pad(ids, ((0, m_pad - M), (0, 0)))
        bias = jnp.pad(bias, ((0, m_pad - M), (0, 0)))

    kernel = functools.partial(_embed_ln_kernel, eps=layer_norm_eps)

    grid_spec = pltpu.PrefetchScalarGridSpec(
        num_scalar_prefetch=0,
        grid=(grid_m,),
        in_specs=[
            pl.BlockSpec((tm, nid), lambda i: (i, 0)),   # ids (row tile)
            pl.BlockSpec((K, H), lambda i: (0, 0)),      # table (invariant)
            pl.BlockSpec((tm, H), lambda i: (i, 0)),     # per-row bias tile
            pl.BlockSpec((1, H), lambda i: (0, 0)),      # LN gamma
            pl.BlockSpec((1, H), lambda i: (0, 0)),      # LN beta
        ],
        out_specs=pl.BlockSpec((tm, H), lambda i: (i, 0)),
    )

    out = pl.pallas_call(
        kernel,
        out_shape=jax.ShapeDtypeStruct((m_pad, H), jnp.float32),
        grid_spec=grid_spec,
        compiler_params=pltpu.CompilerParams(
            dimension_semantics=("parallel",)),
    )(ids, table, bias, gamma, beta)

    return out[:M].reshape(B, S, H)


def _reference(input_ids, params, eps):
    B, S = input_ids.shape
    pos_ids = jnp.broadcast_to(jnp.arange(S, dtype=jnp.int32)[None, :], (B, S))
    tok_ids = jnp.zeros_like(input_ids)
    emb = (params["word_embeddings"][input_ids]
           + params["position_embeddings"][pos_ids]
           + params["token_type_embeddings"][tok_ids])
    mean = jnp.mean(emb, axis=-1, keepdims=True)
    var = jnp.mean((emb - mean) ** 2, axis=-1, keepdims=True)
    normed = (emb - mean) / jnp.sqrt(var + eps)
    return normed * params["ln_weight"] + params["ln_bias"]


if __name__ == "__main__":
    # Small config consistent with ProteinBert embeddings.
    vocab_size = 30
    hidden_size = 32
    max_position_embeddings = 40
    type_vocab_size = 2
    layer_norm_eps = 1e-12
    B, S = 2, 8

    key = jax.random.PRNGKey(0)
    k_w, k_p, k_t, k_ids = jax.random.split(key, 4)

    word_tab = 0.02 * jax.random.normal(k_w, (vocab_size, hidden_size), jnp.float32)
    # nn.Embedding(padding_idx=0): row 0 initialized to zero.
    word_tab = word_tab.at[0].set(0.0)
    pos_tab = 0.02 * jax.random.normal(
        k_p, (max_position_embeddings, hidden_size), jnp.float32)
    type_tab = 0.02 * jax.random.normal(
        k_t, (type_vocab_size, hidden_size), jnp.float32)

    params = dict(
        word_embeddings=word_tab,
        position_embeddings=pos_tab,
        token_type_embeddings=type_tab,
        ln_weight=jnp.ones((hidden_size,), jnp.float32),
        ln_bias=jnp.zeros((hidden_size,), jnp.float32),
    )

    input_ids = jax.random.randint(k_ids, (B, S), 0, vocab_size, dtype=jnp.int32)

    # Default-ids fast path (position/token-type folded into a static bias).
    out = protein_bert_embeddings(input_ids, params, layer_norm_eps=layer_norm_eps)
    out = jax.block_until_ready(out)

    ref = _reference(input_ids, params, layer_norm_eps)
    assert out.shape == (B, S, hidden_size)
    assert jnp.allclose(out, ref, atol=1e-5, rtol=1e-5), "mismatch vs reference"

    # Explicit-ids path (fused-table combined gather) must match too.
    pos_ids = jnp.broadcast_to(jnp.arange(S, dtype=jnp.int32)[None, :], (B, S))
    tok_ids = jnp.zeros_like(input_ids)
    out2 = protein_bert_embeddings(input_ids, params,
                                   token_type_ids=tok_ids, position_ids=pos_ids,
                                   layer_norm_eps=layer_norm_eps)
    out2 = jax.block_until_ready(out2)
    assert jnp.allclose(out2, ref, atol=1e-5, rtol=1e-5), "mismatch (explicit ids)"

    print("KERNEL_OK")
</pallas_src>

<mosaic_0001>
module attributes {stable_mosaic.version = 11 : i64} {
  func.func @_embed_ln_kernel(%arg0: i32, %arg1: memref<16x1xi32, #tpu.memory_space<vmem>>, %arg2: memref<30x32xf32, #tpu.memory_space<vmem>>, %arg3: memref<16x32xf32, #tpu.memory_space<vmem>>, %arg4: memref<1x32xf32, #tpu.memory_space<vmem>>, %arg5: memref<1x32xf32, #tpu.memory_space<vmem>>, %arg6: memref<16x32xf32, #tpu.memory_space<vmem>>) attributes {dimension_semantics = [#tpu.dimension_semantics<parallel>], iteration_bounds = array<i64: 1>, scalar_prefetch = 0 : i64, scratch_operands = 0 : i64, tpu.core_type = #tpu.core_type<tc>, window_params = [{transform_indices = @transform_0, window_bounds = array<i64: 16, 1>}, {pipeline_mode = #tpu.pipeline_mode<synchronous>, transform_indices = @transform_1, window_bounds = array<i64: 30, 32>}, {transform_indices = @transform_2, window_bounds = array<i64: 16, 32>}, {pipeline_mode = #tpu.pipeline_mode<synchronous>, transform_indices = @transform_3, window_bounds = array<i64: 1, 32>}, {pipeline_mode = #tpu.pipeline_mode<synchronous>, transform_indices = @transform_4, window_bounds = array<i64: 1, 32>}, {transform_indices = @transform_5, window_bounds = array<i64: 16, 32>}]} {
    %c0 = arith.constant 0 : index
    %c0_0 = arith.constant 0 : index
    %0 = vector.load %arg1[%c0, %c0_0] : memref<16x1xi32, #tpu.memory_space<vmem>>, vector<16x1xi32>
    %c0_1 = arith.constant 0 : index
    %c0_2 = arith.constant 0 : index
    %1 = vector.load %arg2[%c0_1, %c0_2] : memref<30x32xf32, #tpu.memory_space<vmem>>, vector<30x32xf32>
    %2 = tpu.iota {dimensions = array<i32: 1>} : vector<16x30xi32>
    %3 = vector.broadcast %0 : vector<16x1xi32> to vector<16x30xi32>
    %4 = arith.cmpi eq, %3, %2 : vector<16x30xi32>
    %5 = arith.extui %4 : vector<16x30xi1> to vector<16x30xi32>
    %6 = arith.sitofp %5 : vector<16x30xi32> to vector<16x30xf32>
    %cst = arith.constant dense<0.000000e+00> : vector<16x32xf32>
    %7 = tpu.matmul %6, %1, %cst {dimension_numbers = #tpu.dot_dimension_numbers<[1], [0], [0], [1], [0, 0, 1, 1], [], []>} : vector<16x30xf32>, vector<30x32xf32>, vector<16x32xf32> -> vector<16x32xf32>
    %c0_3 = arith.constant 0 : index
    %c0_4 = arith.constant 0 : index
    %8 = vector.load %arg3[%c0_3, %c0_4] : memref<16x32xf32, #tpu.memory_space<vmem>>, vector<16x32xf32>
    %9 = arith.addf %7, %8 : vector<16x32xf32>
    %cst_5 = arith.constant dense<0.000000e+00> : vector<16xf32>
    %10 = vector.multi_reduction <add>, %9, %cst_5 [1] : vector<16x32xf32> to vector<16xf32>
    %11 = vector.shape_cast %10 : vector<16xf32> to vector<16x1xf32>
    %12 = arith.mulf %9, %9 : vector<16x32xf32>
    %cst_6 = arith.constant dense<0.000000e+00> : vector<16xf32>
    %13 = vector.multi_reduction <add>, %12, %cst_6 [1] : vector<16x32xf32> to vector<16xf32>
    %14 = vector.shape_cast %13 : vector<16xf32> to vector<16x1xf32>
    %cst_7 = arith.constant 3.125000e-02 : f32
    %15 = vector.broadcast %cst_7 : f32 to vector<16x1xf32>
    %16 = arith.mulf %11, %15 : vector<16x1xf32>
    %cst_8 = arith.constant 3.125000e-02 : f32
    %17 = vector.broadcast %cst_8 : f32 to vector<16x1xf32>
    %18 = arith.mulf %14, %17 : vector<16x1xf32>
    %19 = arith.mulf %16, %16 : vector<16x1xf32>
    %20 = arith.subf %18, %19 : vector<16x1xf32>
    %cst_9 = arith.constant 9.99999996E-13 : f32
    %21 = vector.broadcast %cst_9 : f32 to vector<16x1xf32>
    %22 = arith.addf %20, %21 : vector<16x1xf32>
    %23 = math.rsqrt %22 : vector<16x1xf32>
    %24 = vector.broadcast %16 : vector<16x1xf32> to vector<16x32xf32>
    %25 = arith.subf %9, %24 : vector<16x32xf32>
    %26 = vector.broadcast %23 : vector<16x1xf32> to vector<16x32xf32>
    %27 = arith.mulf %25, %26 : vector<16x32xf32>
    %c0_10 = arith.constant 0 : index
    %c0_11 = arith.constant 0 : index
    %28 = vector.load %arg4[%c0_10, %c0_11] : memref<1x32xf32, #tpu.memory_space<vmem>>, vector<1x32xf32>
    %29 = vector.broadcast %28 : vector<1x32xf32> to vector<16x32xf32>
    %30 = arith.mulf %27, %29 : vector<16x32xf32>
    %c0_12 = arith.constant 0 : index
    %c0_13 = arith.constant 0 : index
    %31 = vector.load %arg5[%c0_12, %c0_13] : memref<1x32xf32, #tpu.memory_space<vmem>>, vector<1x32xf32>
    %32 = vector.broadcast %31 : vector<1x32xf32> to vector<16x32xf32>
    %33 = arith.addf %30, %32 : vector<16x32xf32>
    %c0_14 = arith.constant 0 : index
    %c0_15 = arith.constant 0 : index
    %34 = vector.load %arg6[%c0_14, %c0_15] : memref<16x32xf32, #tpu.memory_space<vmem>>, vector<16x32xf32>
    tpu.vector_store %arg6[%c0_14, %c0_15], %33 {strides = array<i32>} : memref<16x32xf32, #tpu.memory_space<vmem>>, vector<16x32xf32>,
    return
  }
  func.func @transform_0(%arg0: i32) -> (i32, i32) {
    %c0_i32 = arith.constant 0 : i32
    %c0_i32_0 = arith.constant 0 : i32
    return %arg0, %c0_i32 : i32, i32
  }
  func.func @transform_1(%arg0: i32) -> (i32, i32) {
    %c0_i32 = arith.constant 0 : i32
    %c0_i32_0 = arith.constant 0 : i32
    %c0_i32_1 = arith.constant 0 : i32
    return %c0_i32, %c0_i32_0 : i32, i32
  }
  func.func @transform_2(%arg0: i32) -> (i32, i32) {
    %c0_i32 = arith.constant 0 : i32
    %c0_i32_0 = arith.constant 0 : i32
    return %arg0, %c0_i32 : i32, i32
  }
  func.func @transform_3(%arg0: i32) -> (i32, i32) {
    %c0_i32 = arith.constant 0 : i32
    %c0_i32_0 = arith.constant 0 : i32
    %c0_i32_1 = arith.constant 0 : i32
    return %c0_i32, %c0_i32_0 : i32, i32
  }
  func.func @transform_4(%arg0: i32) -> (i32, i32) {
    %c0_i32 = arith.constant 0 : i32
    %c0_i32_0 = arith.constant 0 : i32
    %c0_i32_1 = arith.constant 0 : i32
    return %c0_i32, %c0_i32_0 : i32, i32
  }
  func.func @transform_5(%arg0: i32) -> (i32, i32) {
    %c0_i32 = arith.constant 0 : i32
    %c0_i32_0 = arith.constant 0 : i32
    return %arg0, %c0_i32 : i32, i32
  }
}

</mosaic_0001>

<bundles_post_ra>
// kernel: tpu_custom_call.1
= control target key start
LH: loop header
LB: loop body
LE: loop exit
PB: predicated region body
PF: predicated region fallthrough
CT: control target
= control target key end

     0   :  { %10 = vsyncpa [#allocation3], 0  ;;  %s321_s0 = inlined_call_operand.vmem [shape: s32[16,1], index: 0, kind: input, shape index: {}]   ;;  %s322_s1 = inlined_call_operand.hbm [shape: f32[30,32], index: 1, kind: input, shape index: {}]   ;;  %s323_s2 = inlined_call_operand.vmem [shape: f32[16,32], index: 2, kind: input, shape index: {}]   ;;  %s324_s3 = inlined_call_operand.vmem [shape: f32[1,32], index: 3, kind: input, shape index: {}]   ;;  %s325_s4 = inlined_call_operand.vmem [shape: f32[1,32], index: 4, kind: input, shape index: {}]   ;;  %s326_s5 = inlined_call_operand.hbm [shape: f32[16,32], index: 5, kind: output, shape index: {}]  }
   0x1   :  { %11 = vsyncpa [#allocation4], 0  ;;  %s18_s20 = sshll.u32 %s322_s1, 4  ;;  %s249_s21 = smov [#allocation2]   ;;  %s19_s20 = int_to_ptr.hbm [resolvable:$true] %s18_s20 }
   0x2   :  { %s20_s22 = sshll.u32 %s249_s21, 4  ;;  %s250_s23 = smov 128   ;;  %s21_s22 = int_to_ptr.vmem [resolvable:$true] %s20_s22 }
   0x3   :  { %s251_s24 = smov 8  }
   0x4   :  { %26 = dma.hbm_to_vmem [thread:$0]  %s19_s20, 512, %s21_s22, [#allocation3], %s250_s23, %s250_s23, %s251_s24  }
   0x5   :  { %245 = dma.done.wait [#allocation3], 512  }
   0x6   :  { %246 = vsyncadd [#allocation3], 4294966784  ;;  %v252_v0 = vmov 0   ;;  %vm66_vm0 = vcmask 1045504   ;;  %v37_v1 = vld [vmem:[%s321_s0] sm:$0xff]  ;;  %v41_v3 = vld [vmem:[#allocation2 + $0x10] sm:$0xff]  ;;  %v43_v7 = vlaneseq }
   0x7   :  { %190 = vset.pattern.permute.xlu0 %v252_v0  ;;  %v42_v2 = vld [vmem:[#allocation2 + $0x18] sm:$0x3f]  ;;  %v40_v4 = vld [vmem:[#allocation2 + $0x8] sm:$0xff]  ;;  %v39_v6 = vld [vmem:[#allocation2] sm:$0xff]  ;;  %vm59_vm1 = vcmask 244736   ;;  %v253_v10 = vmov 0.0  }
   0x8   :  { %46 = vperm.xlu0 %190, %v37_v1   ;;  %177 = vmatpush.msk.msra.mxu0 %vm66_vm0, %v42_v2  ;;  %v38_v5 = vld [vmem:[%s321_s0 + $0x8] sm:$0xff]  ;;  %v44_v8 = vand.u32 127, %v43_v7  ;;  %v57_v14 = vld [vmem:[%s323_s2] sm:$0xff]  ;;  %vm93_vm4 = vcmask 261120   ;;  %s162_s12 = sshll.u32 %s326_s5, 4  ;;  %s163_s12 = int_to_ptr.hbm [resolvable:$true] %s162_s12 }
   0x9   :  { %180 = vmatpush.msk.msra.mxu1 %vm66_vm0, %v42_v2  ;;  %v58_v20 = vld [vmem:[%s323_s2 + $0x8] sm:$0xff]  ;;  %v191_v49 = vld [vmem:[%s324_s3] ss:$0 sm:$0xff]  ;;  %s254_s3 = smov [#allocation5]  }
   0xa   :  { %83 = vmatpush.msra.mxu0 %v41_v3  ;;  %v192_v53 = vld [vmem:[%s325_s4] ss:$0 sm:$0xff]  ;;  %s160_s9 = sshll.u32 %s254_s3, 4  ;;  %s161_s9 = int_to_ptr.vmem [resolvable:$true] %s160_s9 }
   0xb   :  { %181 = vmatpush.msra.mxu1 %v41_v3 }
   0xc   :  { %84 = vmatpush.msra.mxu0 %v40_v4 }
   0xd   :  { %182 = vmatpush.msra.mxu1 %v40_v4 }
   0xe   :  { %85 = vmatpush.msra.mxu0 %v39_v6 }
   0xf   :  { %183 = vmatpush.msra.mxu1 %v39_v6 }
  0x10   :  { %49 = vperm.xlu0 %190, %v38_v5  }
  0x7a   :  { %v47_v9 = vpop.permute.xlu0 %46 }
  0x7b   :  { %vm51_vm2 = vcmp.eq.s32.totalorder %v47_v9, %v44_v8 }
  0x7c   :  { %v175_v11 = vsel %vm51_vm2, 1.0, %v253_v10 }
  0x7d   :  { %178 = vmatmul.msk.f32.vlgmr.msra.gmra.mxu0 %vm59_vm1, %v175_v11 }
  0x82   :  { %v50_v12 = vpop.permute.xlu0 %49 }
  0x83   :  { %vm52_vm3 = vcmp.eq.s32.totalorder %v50_v12, %v44_v8 }
  0x84   :  { %v176_v13 = vsel %vm52_vm3, 1.0, %v253_v10 }
  0x85   :  { %179 = vmatmul.msk.f32.vlgmr.msra.gmra.mxu1 %vm59_vm1, %v176_v13 }
  0xfa   :  { %v87_v15 = vpop.f32.mrf.mxu0 }
  0xfb   :  { %v88_v16 = vadd.f32 %v87_v15, %v57_v14 }
  0xfd   :  { %v94_v17 = vsel %vm93_vm4, %v88_v16, 0.0  ;;  %v100_v18 = vmul.f32 %v88_v16, %v88_v16 }
  0xfe   :  { %95 = vadd.xlane.f32.xlu1 %v94_v17 }
  0xff   :  { %v102_v19 = vsel %vm93_vm4, %v100_v18, 0.0 }
 0x100   :  { %103 = vadd.xlane.f32.xlu2 %v102_v19 }
 0x102   :  { %v90_v21 = vpop.f32.mrf.mxu1 }
 0x103   :  { %v91_v22 = vadd.f32 %v90_v21, %v58_v20 }
 0x105   :  { %v97_v23 = vsel %vm93_vm4, %v91_v22, 0.0  ;;  %v101_v24 = vmul.f32 %v91_v22, %v91_v22 }
 0x106   :  { %98 = vadd.xlane.f32.xlu1 %v97_v23 }
 0x107   :  { %v105_v25 = vsel %vm93_vm4, %v101_v24, 0.0 }
 0x108   :  { %106 = vadd.xlane.f32.xlu2 %v105_v25 }
 0x171   :  { %v96_v26 = vpop.xlane.xlu1 %95 }
 0x172   :  { %v108_v27 = vmul.f32 0.03125, %v96_v26 }
 0x173   :  { %v104_v28 = vpop.xlane.xlu2 %103 }
 0x174   :  { %v112_v29 = vmul.f32 %v108_v27, %v108_v27  ;;  %v110_v30 = vmul.f32 0.03125, %v104_v28  ;;  %v138_v48 = vsub.f32 %v88_v16, %v108_v27 }
 0x176   :  { %v114_v31 = vsub.f32 %v110_v30, %v112_v29 }
 0x178   :  { %v116_v32 = vadd.f32 1e-12, %v114_v31 }
 0x179   :  { %v99_v33 = vpop.xlane.xlu1 %98 }
 0x17a   :  { %193 = vrsqrt.f32 %v116_v32  ;;  %v109_v34 = vmul.f32 0.03125, %v99_v33  ;;  %vm124_vm6 = vweird.f32 %v116_v32 }
 0x17b   :  { %v107_v35 = vpop.xlane.xlu2 %106 }
 0x17c   :  { %v113_v36 = vmul.f32 %v109_v34, %v109_v34  ;;  %v111_v37 = vmul.f32 0.03125, %v107_v35  ;;  %v139_v59 = vsub.f32 %v91_v22, %v109_v34 }
 0x17e   :  { %v115_v38 = vsub.f32 %v111_v37, %v113_v36 }
 0x180   :  { %v194_v39 = vpop.eup %193  ;;  %v117_v40 = vadd.f32 1e-12, %v115_v38 }
 0x181   :  { %v119_v41 = vmul.f32 %v194_v39, %v116_v32  ;;  %vm125_vm5 = vweird.f32 %v194_v39 }
 0x182   :  { %195 = vrsqrt.f32 %v117_v40  ;;  %vm126_vm7 = vmor %vm124_vm6, %vm125_vm5  ;;  %vm134_vm9 = vweird.f32 %v117_v40 }
 0x183   :  { %v120_v42 = vmul.f32 %v194_v39, %v119_v41 }
 0x185   :  { %v121_v43 = vmul.f32 0.5, %v120_v42 }
 0x187   :  { %v122_v44 = vsub.f32 1.5, %v121_v43 }
 0x188   :  { %v196_v45 = vpop.eup %195 }
 0x189   :  { %v123_v46 = vmul.f32 %v194_v39, %v122_v44  ;;  %v129_v47 = vmul.f32 %v196_v45, %v117_v40  ;;  %vm135_vm8 = vweird.f32 %v196_v45 }
 0x18a   :  { %vm136_vm10 = vmor %vm134_vm9, %vm135_vm8 }
 0x18b   :  { %v127_v50 = vsel %vm126_vm7, %v194_v39, %v123_v46  ;;  %v130_v51 = vmul.f32 %v196_v45, %v129_v47 }
 0x18c   :  { %v140_v52 = vmul.f32 %v138_v48, %v127_v50 }
 0x18d   :  { %v131_v54 = vmul.f32 0.5, %v130_v51 }
 0x18e   :  { %v146_v55 = vmul.f32 %v191_v49, %v140_v52 }
 0x18f   :  { %v132_v56 = vsub.f32 1.5, %v131_v54 }
 0x190   :  { %v152_v57 = vadd.f32 %v192_v53, %v146_v55 }
 0x191   :  { %v133_v58 = vmul.f32 %v196_v45, %v132_v56 }
 0x192   :  { %154 = vst.msk [vmem:[#allocation5] sm:$0xff] %vm93_vm4, %v152_v57 }
 0x193   :  { %v137_v60 = vsel %vm136_vm10, %v196_v45, %v133_v58 }
 0x194   :  { %v141_v61 = vmul.f32 %v139_v59, %v137_v60 }
 0x196   :  { %v147_v62 = vmul.f32 %v191_v49, %v141_v61 }
 0x198   :  { %v153_v63 = vadd.f32 %v192_v53, %v147_v62 }
 0x19a   :  { %155 = vst.msk [vmem:[#allocation5 + $0x8] sm:$0xff] %vm93_vm4, %v153_v63 }
 0x19b   :  { %168 = dma.vmem_to_hbm [thread:$0]  %s161_s9, 256, %s163_s12, [#allocation4], %s250_s23, %s250_s23, %s251_s24  }
 0x19c   :  { %247 = dma.done.wait [#allocation4], 256  }
 0x19d   :  { %248 = vsyncadd [#allocation4], 4294967040 }
 0x19e   :  { %173 = vsyncpa [#allocation3], 1 }
 0x19f   :  { %174 = vsyncpa [#allocation4], 1 }

</bundles_post_ra>
